<compile_context>
chip_gen: v7x
topology: tpu7x:2x2x1
jax: 0.10.0
libtpu: 0.0.40
codegen_flags: <defaults>
</compile_context>

<pallas_src>
import jax
import jax.numpy as jnp
from jax import lax
from jax.experimental import pallas as pl
from jax.experimental.pallas import tpu as pltpu


def _rand_like_kernel(seed_ref, out_ref):
    """Fill out_ref with uniform[0,1) values of out_ref's dtype.

    Counter-based hash PRNG: per-element linear index mixed with a seed via a
    splitmix32-style finalizer.  Only elementwise VPU integer ops + one
    same-width bitcast, so it works on TPU (Mosaic) and in interpret mode.
    """
    shape = out_ref.shape

    # Per-element linear index ("counter") in uint32.
    strides = pl.strides_from_shape(shape)
    idx = jnp.zeros(shape, dtype=jnp.uint32)
    for dim, stride in enumerate(strides):
        idx = idx + lax.broadcasted_iota(jnp.uint32, shape, dim) * jnp.uint32(stride)

    seed = seed_ref[0].astype(jnp.uint32)

    # splitmix32-style mixing: counter * golden-ratio + seed, then finalize.
    x = idx * jnp.uint32(0x9E3779B9) + seed
    x = x ^ (x >> jnp.uint32(16))
    x = x * jnp.uint32(0x7FEB352D)
    x = x ^ (x >> jnp.uint32(15))
    x = x * jnp.uint32(0x846CA68B)
    x = x ^ (x >> jnp.uint32(16))

    # Exponent bit-trick: top 23 random bits as the mantissa of a float in
    # [1, 2), then subtract 1.0 -> uniform [0, 1).  Saves the int->float
    # convert of the shift+scale recipe.
    fbits = (x >> jnp.uint32(9)) | jnp.uint32(0x3F800000)
    u = lax.bitcast_convert_type(fbits, jnp.float32) - jnp.float32(1.0)

    # Cast only at the final store (keeps all intermediates in 32-bit).
    out_ref[...] = u.astype(out_ref.dtype)

    # TODO(synk): F.dropout(x1, p=0.5) in the reference module is dead code
    # (its result is discarded), so it is intentionally not computed here.


def rand_like_pallas(x1: jax.Array, seed: int = 0) -> jax.Array:
    """torch.rand_like(x1): uniform[0,1) tensor with x1's shape/dtype.

    Note: the seed is explicit; pass a different value per call (e.g. derived
    from a JAX key or a counter) if call-to-call independence is required.
    """
    seed_arr = jnp.asarray([seed], dtype=jnp.int32)
    return pl.pallas_call(
        _rand_like_kernel,
        out_shape=jax.ShapeDtypeStruct(x1.shape, x1.dtype),
        in_specs=[pl.BlockSpec(memory_space=pltpu.SMEM)],
        out_specs=pl.BlockSpec(memory_space=pltpu.VMEM),
    )(seed_arr)


if __name__ == "__main__":
    key = jax.random.PRNGKey(0)
    # x1 = torch.randn(1, 2, 2)
    x1 = jax.random.normal(key, (1, 2, 2), dtype=jnp.float32)

    # Derive a deterministic seed for this call from a JAX key.
    seed = int(jax.random.randint(jax.random.fold_in(key, 1), (), 0, 2**31 - 1))

    out = rand_like_pallas(x1, seed=seed)
    out = jax.block_until_ready(out)

    assert out.shape == x1.shape and out.dtype == x1.dtype
    assert bool(jnp.all(out >= 0.0)) and bool(jnp.all(out < 1.0))
    print("KERNEL_OK")
</pallas_src>

<mosaic_0001>
module attributes {stable_mosaic.version = 11 : i64} {
  func.func @_rand_like_kernel(%arg0: memref<1xi32, #tpu.memory_space<smem>>, %arg1: memref<1x2x2xf32, #tpu.memory_space<vmem>>) attributes {dimension_semantics = [], scalar_prefetch = 0 : i64, scratch_operands = 0 : i64, tpu.core_type = #tpu.core_type<tc>} {
    %c0_i32 = arith.constant 0 : i32
    %0 = vector.broadcast %c0_i32 : i32 to vector<1x2x2xi32>
    %1 = tpu.iota {dimensions = array<i32: 0>} : vector<1x2x2xi32>
    %c4_i32 = arith.constant 4 : i32
    %2 = vector.broadcast %c4_i32 : i32 to vector<1x2x2xi32>
    %3 = arith.muli %1, %2 : vector<1x2x2xi32>
    %4 = arith.addi %0, %3 : vector<1x2x2xi32>
    %5 = tpu.iota {dimensions = array<i32: 1>} : vector<1x2x2xi32>
    %c2_i32 = arith.constant 2 : i32
    %6 = vector.broadcast %c2_i32 : i32 to vector<1x2x2xi32>
    %7 = arith.muli %5, %6 : vector<1x2x2xi32>
    %8 = arith.addi %4, %7 : vector<1x2x2xi32>
    %9 = tpu.iota {dimensions = array<i32: 2>} : vector<1x2x2xi32>
    %c1_i32 = arith.constant 1 : i32
    %10 = vector.broadcast %c1_i32 : i32 to vector<1x2x2xi32>
    %11 = arith.muli %9, %10 : vector<1x2x2xi32>
    %12 = arith.addi %8, %11 : vector<1x2x2xi32>
    %c0 = arith.constant 0 : index
    %13 = memref.load %arg0[%c0] : memref<1xi32, #tpu.memory_space<smem>>
    %c-1640531527_i32 = arith.constant -1640531527 : i32
    %14 = vector.broadcast %c-1640531527_i32 : i32 to vector<1x2x2xi32>
    %15 = arith.muli %12, %14 : vector<1x2x2xi32>
    %16 = vector.broadcast %13 : i32 to vector<1x2x2xi32>
    %17 = arith.addi %15, %16 : vector<1x2x2xi32>
    %c16_i32 = arith.constant 16 : i32
    %18 = vector.broadcast %c16_i32 : i32 to vector<1x2x2xi32>
    %19 = arith.shrui %17, %18 : vector<1x2x2xi32>
    %20 = arith.xori %17, %19 : vector<1x2x2xi32>
    %c2146121005_i32 = arith.constant 2146121005 : i32
    %21 = vector.broadcast %c2146121005_i32 : i32 to vector<1x2x2xi32>
    %22 = arith.muli %20, %21 : vector<1x2x2xi32>
    %c15_i32 = arith.constant 15 : i32
    %23 = vector.broadcast %c15_i32 : i32 to vector<1x2x2xi32>
    %24 = arith.shrui %22, %23 : vector<1x2x2xi32>
    %25 = arith.xori %22, %24 : vector<1x2x2xi32>
    %c-2073254261_i32 = arith.constant -2073254261 : i32
    %26 = vector.broadcast %c-2073254261_i32 : i32 to vector<1x2x2xi32>
    %27 = arith.muli %25, %26 : vector<1x2x2xi32>
    %c16_i32_0 = arith.constant 16 : i32
    %28 = vector.broadcast %c16_i32_0 : i32 to vector<1x2x2xi32>
    %29 = arith.shrui %27, %28 : vector<1x2x2xi32>
    %30 = arith.xori %27, %29 : vector<1x2x2xi32>
    %c9_i32 = arith.constant 9 : i32
    %31 = vector.broadcast %c9_i32 : i32 to vector<1x2x2xi32>
    %32 = arith.shrui %30, %31 : vector<1x2x2xi32>
    %c1065353216_i32 = arith.constant 1065353216 : i32
    %33 = vector.broadcast %c1065353216_i32 : i32 to vector<1x2x2xi32>
    %34 = arith.ori %32, %33 : vector<1x2x2xi32>
    %35 = tpu.bitcast %34 : vector<1x2x2xi32> -> vector<1x2x2xf32>
    %cst = arith.constant 1.000000e+00 : f32
    %36 = vector.broadcast %cst : f32 to vector<1x2x2xf32>
    %37 = arith.subf %35, %36 : vector<1x2x2xf32>
    %c0_1 = arith.constant 0 : index
    %c0_2 = arith.constant 0 : index
    %c0_3 = arith.constant 0 : index
    %38 = vector.load %arg1[%c0_1, %c0_2, %c0_3] : memref<1x2x2xf32, #tpu.memory_space<vmem>>, vector<1x2x2xf32>
    tpu.vector_store %arg1[%c0_1, %c0_2, %c0_3], %37 {strides = array<i32>} : memref<1x2x2xf32, #tpu.memory_space<vmem>>, vector<1x2x2xf32>,
    return
  }
}

</mosaic_0001>

<bundles_post_ra>
// kernel: tpu_custom_call.1
= control target key start
LH: loop header
LB: loop body
LE: loop exit
PB: predicated region body
PF: predicated region fallthrough
CT: control target
= control target key end

     0   :  { %v10_v0 = vlaneseq  ;;  %s100_s0 = inlined_call_operand.<no memory space> [shape: s32[1], index: 0, kind: input, shape index: {}]   ;;  %s101_s1 = inlined_call_operand.hbm [shape: f32[1,2,2], index: 1, kind: output, shape index: {}]  }
   0x1   :  { %7 = vsyncpa [#allocation4], 0  ;;  %v18_v5 = vstv %s100_s0  ;;  %s74_s8 = smov [#allocation3]   ;;  %vm32_vm0 = vcmask 9216  }
   0x2   :  { %v11_v1 = vshrl.u32 %v10_v0, 7  ;;  %v14_v2 = vand.u32 127, %v10_v0  ;;  %s40_s9 = sshll.u32 %s74_s8, 4  ;;  %s41_s9 = int_to_ptr.vmem [resolvable:$true] %s40_s9 }
   0x3   :  { %s50_s10 = scalar_lea.vmem %s41_s9, 32  ;;  %p55_p1 = scmp.lt.s32.totalorder %s41_s9, %s41_s9 }
   0x4   :  { %v12_v3 = vmul.u32 2, %v11_v1  ;;  %p51_p0 = scmp.ne.s32.totalorder %s41_s9, %s50_s10  ;;  %p56_p2 = scmp.lt.s32.totalorder %s50_s10, %s50_s10 }
   0x6   :  { %v15_v4 = vadd.s32 %v14_v2, %v12_v3  ;;  %p57_p3 = por %p56_p2, %p55_p1 }
   0x8   :  { %v17_v6 = vmul.u32 2654435769, %v15_v4  ;;  %p58_p4 = pnand %p57_p3, %p51_p0 }
   0xa   :  { %v19_v7 = vadd.s32 %v18_v5, %v17_v6 }
   0xc   :  { %v20_v8 = vshrl.u32 %v19_v7, 16 }
   0xe   :  { %v21_v9 = vxor.u32 %v20_v8, %v19_v7 }
  0x10   :  { %v22_v10 = vmul.u32 2146121005, %v21_v9 }
  0x12   :  { %v23_v11 = vshrl.u32 %v22_v10, 15 }
  0x14   :  { %v24_v12 = vxor.u32 %v23_v11, %v22_v10 }
  0x16   :  { %v25_v13 = vmul.u32 2221713035, %v24_v12 }
  0x18   :  { %v26_v14 = vshrl.u32 %v25_v13, 16 }
  0x1a   :  { %v27_v15 = vxor.u32 %v26_v14, %v25_v13 }
  0x1c   :  { %v28_v16 = vshrl.u32 %v27_v15, 9 }
  0x1e   :  { %v29_v17 = vor.u32 1065353216, %v28_v16 }
  0x20   :  { %v48_v18 = vadd.f32 -1.0, %v29_v17 }
  0x22   :  { %33 = vst.msk [vmem:[#allocation3] sm:$0x3] %vm32_vm0, %v48_v18 }
  0x23   :  { %61 = shalt.err (!%p58_p4)
}
  0x24   :  { %s62_s12 = scalar_lea.hbm %s101_s1, 32 }
  0x25   :  { %p63_p5 = scmp.ne.s32.totalorder %s101_s1, %s62_s12  ;;  %p66_p6 = scmp.lt.u32.totalorder %s62_s12, %s101_s1 }
  0x27   :  { %p68_p7 = pnand %p66_p6, %p63_p5 }
  0x29   :  { %71 = shalt.err (!%p68_p7)
}
  0x2a   :  { %43 = dma.vmem_to_hbm [thread:$0]  %s41_s9, 32, %s101_s1, [#allocation4]  }
  0x2b   :  { %72 = dma.done.wait [#allocation4], 32  }
  0x2c   :  { %73 = vsyncadd [#allocation4], 4294967264 }
  0x2d   :  { %47 = vsyncpa [#allocation4], 1 }

</bundles_post_ra>
